<compile_context>
chip_gen: v6e
topology: v6e:2x2x1
jax: 0.10.0
libtpu: 0.0.40
codegen_flags: <defaults>
</compile_context>

<pallas_src>
import jax
import jax.numpy as jnp
from jax.experimental import pallas as pl
from jax.experimental.pallas import tpu as pltpu


def _round_up(v, m):
    return ((v + m - 1) // m) * m


def _pick_tile(dim, max_tile, align):
    """Largest multiple of `align` that divides `dim` and is <= max_tile.

    `dim` is already rounded up to a multiple of `align`, so `align` is always
    a valid fallback. Choosing a divisor of `dim` means no tile-multiple
    padding is ever needed.
    """
    best = align
    t = align
    limit = min(max_tile, dim)
    while t <= limit:
        if dim % t == 0:
            best = t
        t += align
    return best


def _default_config():
    """Generation-aware tile / VMEM defaults (safe fallback if query fails)."""
    tm, tn, tk = 512, 512, 1024
    vmem_limit = 48 * 1024 * 1024          # safe on v7x's 64 MiB per-TC VMEM
    try:
        vmem_bytes = pltpu.get_tpu_info().vmem_capacity_bytes
        if vmem_bytes >= 100 * 1024 * 1024:    # v5e / v6e: 128 MiB physical
            tm, tn = 1024, 1024                # ~512 flop/byte on v6e
            vmem_limit = 64 * 1024 * 1024
    except Exception:
        pass
    return tm, tn, tk, vmem_limit


def _mylinear_kernel(x_ref, w_ref, b_ref, o_ref, acc_ref):
    k = pl.program_id(2)

    @pl.when(k == 0)
    def _init():
        acc_ref[...] = jnp.zeros_like(acc_ref)

    # MXU matmul on bf16 tiles, f32 accumulation.
    acc_ref[...] += jnp.dot(
        x_ref[...], w_ref[...], preferred_element_type=jnp.float32
    )

    # Bias add + ReLU once per output tile, on the f32 accumulator.
    @pl.when(k == pl.num_programs(2) - 1)
    def _finalize():
        acc = acc_ref[...] + b_ref[...].astype(jnp.float32)  # (tm,tn)+(1,tn)
        o_ref[...] = jnp.maximum(acc, 0.0).astype(o_ref.dtype)


def mylinear_forward(x, weight, bias, *, tm=None, tn=None, tk=None):
    """relu(x @ weight + bias) via a tiled, pipelined Pallas TPU kernel.

    x:      (M, K) float32 (cast to bf16 internally)
    weight: (K, N) float32 (cast to bf16 internally)
    bias:   (N,)   float32
    returns (M, N) x.dtype
    """
    M, K = x.shape
    K2, N = weight.shape
    assert K == K2, "in_units mismatch"
    out_dtype = x.dtype

    tm_d, tn_d, tk_d, vmem_limit = _default_config()
    tm_max = tm if tm is not None else tm_d
    tn_max = tn if tn is not None else tn_d
    tk_max = tk if tk is not None else tk_d

    # Minimal padding: only to hardware alignment (16 sublanes for the bf16
    # operands, 128 lanes), never up to tile multiples.
    Mp = _round_up(M, 16)
    Kp = _round_up(K, 128)
    Np = _round_up(N, 128)

    # Full-K tiles when K is modest (amortizes per-step overhead and the
    # acc_ref read-modify-write).
    if tk is None and Kp <= 2048:
        tk_max = Kp

    tm_t = _pick_tile(Mp, tm_max, 16)
    tn_t = _pick_tile(Np, tn_max, 128)
    tk_t = _pick_tile(Kp, tk_max, 128)

    # v7x megacore: ensure at least one "parallel" axis has >= 2 blocks so the
    # matmul doesn't serialize on one TensorCore (no-op / negligible on 1-TC
    # chips). Prefer splitting M; only if the resulting tile stays reasonable.
    if (Mp // tm_t == 1) and (Np // tn_t == 1) and Mp >= 256:
        cand = _pick_tile(Mp, Mp // 2, 16)
        if cand >= 128:
            tm_t = cand

    grid = (Mp // tm_t, Np // tn_t, Kp // tk_t)
    i_blocks, j_blocks, _ = grid

    # bf16 operands, f32 bias; zero-padding is semantics-preserving for
    # matmul + bias + relu and is sliced off below.
    xb = x.astype(jnp.bfloat16)
    wb = weight.astype(jnp.bfloat16)
    bf = bias.astype(jnp.float32)
    if Mp != M or Kp != K:
        xb = jnp.pad(xb, ((0, Mp - M), (0, Kp - K)))
    if Kp != K or Np != N:
        wb = jnp.pad(wb, ((0, Kp - K), (0, Np - N)))
    if Np != N:
        bf = jnp.pad(bf, ((0, Np - N),))
    b2d = bf.reshape(1, Np)

    out_itemsize = jnp.dtype(out_dtype).itemsize
    cost = pl.CostEstimate(
        flops=2 * Mp * Kp * Np,
        transcendentals=0,
        bytes_accessed=(
            Mp * Kp * 2 * j_blocks        # x re-streamed per N tile (bf16)
            + Kp * Np * 2 * i_blocks      # w re-streamed per M tile (bf16)
            + Np * 4 * i_blocks           # bias per M tile (f32)
            + Mp * Np * out_itemsize      # output written once
        ),
    )

    out_padded = pl.pallas_call(
        _mylinear_kernel,
        out_shape=jax.ShapeDtypeStruct((Mp, Np), out_dtype),
        grid_spec=pltpu.PrefetchScalarGridSpec(
            num_scalar_prefetch=0,
            grid=grid,
            in_specs=[
                pl.BlockSpec((tm_t, tk_t), lambda i, j, k: (i, k)),  # x tile
                pl.BlockSpec((tk_t, tn_t), lambda i, j, k: (k, j)),  # w tile
                pl.BlockSpec((1, tn_t), lambda i, j, k: (0, j)),     # bias
            ],
            out_specs=pl.BlockSpec((tm_t, tn_t), lambda i, j, k: (i, j)),
            scratch_shapes=[pltpu.VMEM((tm_t, tn_t), jnp.float32)],
        ),
        compiler_params=pltpu.CompilerParams(
            dimension_semantics=("parallel", "parallel", "arbitrary"),
            vmem_limit_bytes=vmem_limit,
        ),
        cost_estimate=cost,
    )(xb, wb, b2d)

    return out_padded[:M, :N]


if __name__ == "__main__":
    # Shapes implied by MyLinear(in_units, units) applied to a 2-D batch input.
    batch, in_units, units = 8, 32, 64

    key = jax.random.PRNGKey(0)
    kx, kw, kb = jax.random.split(key, 3)

    x = jax.random.normal(kx, (batch, in_units), dtype=jnp.float32)
    weight = jax.random.normal(kw, (in_units, units), dtype=jnp.float32)
    bias = jax.random.normal(kb, (units,), dtype=jnp.float32)

    out = jax.block_until_ready(mylinear_forward(x, weight, bias))
    # Reference with the same bf16 operand rounding / f32 accumulation.
    ref = jnp.maximum(
        jnp.dot(
            x.astype(jnp.bfloat16),
            weight.astype(jnp.bfloat16),
            preferred_element_type=jnp.float32,
        )
        + bias,
        0.0,
    )
    assert out.shape == (batch, units)
    assert jnp.allclose(out, ref, atol=1e-2, rtol=1e-2), "mismatch (small)"

    # Exercise the multi-tile path (grid > 1 on every axis, K-reduction loop)
    # with explicit small tiles so shapes stay modest.
    Mb, Kb, Nb = 256, 512, 384
    kx2, kw2, kb2 = jax.random.split(jax.random.PRNGKey(1), 3)
    xb = jax.random.normal(kx2, (Mb, Kb), dtype=jnp.float32)
    wb = jax.random.normal(kw2, (Kb, Nb), dtype=jnp.float32)
    bb = jax.random.normal(kb2, (Nb,), dtype=jnp.float32)

    outb = jax.block_until_ready(
        mylinear_forward(xb, wb, bb, tm=128, tn=128, tk=256)
    )
    refb = jnp.maximum(
        jnp.dot(
            xb.astype(jnp.bfloat16),
            wb.astype(jnp.bfloat16),
            preferred_element_type=jnp.float32,
        )
        + bb,
        0.0,
    )
    assert outb.shape == (Mb, Nb)
    assert jnp.allclose(outb, refb, atol=2e-2, rtol=2e-2), "mismatch (tiled)"

    print("KERNEL_OK")
</pallas_src>

<mosaic_0001>
module attributes {stable_mosaic.version = 11 : i64} {
  func.func @_mylinear_kernel(%arg0: i32, %arg1: i32, %arg2: i32, %arg3: memref<16x128xbf16, #tpu.memory_space<vmem>>, %arg4: memref<128x128xbf16, #tpu.memory_space<vmem>>, %arg5: memref<1x128xf32, #tpu.memory_space<vmem>>, %arg6: memref<16x128xf32, #tpu.memory_space<vmem>>, %arg7: memref<16x128xf32, #tpu.memory_space<vmem>>) attributes {dimension_semantics = [#tpu.dimension_semantics<parallel>, #tpu.dimension_semantics<parallel>, #tpu.dimension_semantics<arbitrary>], iteration_bounds = array<i64: 1, 1, 1>, scalar_prefetch = 0 : i64, scratch_operands = 1 : i64, tpu.core_type = #tpu.core_type<tc>, window_params = [{transform_indices = @transform_0, window_bounds = array<i64: 16, 128>}, {transform_indices = @transform_1, window_bounds = array<i64: 128, 128>}, {transform_indices = @transform_2, window_bounds = array<i64: 1, 128>}, {transform_indices = @transform_3, window_bounds = array<i64: 16, 128>}]} {
    %c0_i32 = arith.constant 0 : i32
    %0 = arith.cmpi eq, %arg2, %c0_i32 : i32
    %1 = arith.extui %0 : i1 to i32
    %c0_i32_0 = arith.constant 0 : i32
    %2 = arith.cmpi ne, %1, %c0_i32_0 : i32
    scf.if %2 {
      %cst_10 = arith.constant 0.000000e+00 : f32
      %12 = vector.broadcast %cst_10 : f32 to vector<16x128xf32>
      %c0_11 = arith.constant 0 : index
      %c0_12 = arith.constant 0 : index
      %13 = vector.load %arg7[%c0_11, %c0_12] : memref<16x128xf32, #tpu.memory_space<vmem>>, vector<16x128xf32>
      tpu.vector_store %arg7[%c0_11, %c0_12], %12 {strides = array<i32>} : memref<16x128xf32, #tpu.memory_space<vmem>>, vector<16x128xf32>,
    } else {
    }
    %c0 = arith.constant 0 : index
    %c0_1 = arith.constant 0 : index
    %3 = vector.load %arg7[%c0, %c0_1] : memref<16x128xf32, #tpu.memory_space<vmem>>, vector<16x128xf32>
    %c0_2 = arith.constant 0 : index
    %c0_3 = arith.constant 0 : index
    %4 = vector.load %arg3[%c0_2, %c0_3] : memref<16x128xbf16, #tpu.memory_space<vmem>>, vector<16x128xbf16>
    %c0_4 = arith.constant 0 : index
    %c0_5 = arith.constant 0 : index
    %5 = vector.load %arg4[%c0_4, %c0_5] : memref<128x128xbf16, #tpu.memory_space<vmem>>, vector<128x128xbf16>
    %cst = arith.constant dense<0.000000e+00> : vector<16x128xf32>
    %6 = tpu.matmul %4, %5, %cst {dimension_numbers = #tpu.dot_dimension_numbers<[1], [0], [0], [1], [0, 0, 1, 1], [], []>} : vector<16x128xbf16>, vector<128x128xbf16>, vector<16x128xf32> -> vector<16x128xf32>
    %7 = arith.addf %3, %6 : vector<16x128xf32>
    %c0_6 = arith.constant 0 : index
    %c0_7 = arith.constant 0 : index
    %8 = vector.load %arg7[%c0_6, %c0_7] : memref<16x128xf32, #tpu.memory_space<vmem>>, vector<16x128xf32>
    tpu.vector_store %arg7[%c0_6, %c0_7], %7 {strides = array<i32>} : memref<16x128xf32, #tpu.memory_space<vmem>>, vector<16x128xf32>,
    %c0_i32_8 = arith.constant 0 : i32
    %9 = arith.cmpi eq, %arg2, %c0_i32_8 : i32
    %10 = arith.extui %9 : i1 to i32
    %c0_i32_9 = arith.constant 0 : i32
    %11 = arith.cmpi ne, %10, %c0_i32_9 : i32
    scf.if %11 {
      %c0_10 = arith.constant 0 : index
      %c0_11 = arith.constant 0 : index
      %12 = vector.load %arg7[%c0_10, %c0_11] : memref<16x128xf32, #tpu.memory_space<vmem>>, vector<16x128xf32>
      %c0_12 = arith.constant 0 : index
      %c0_13 = arith.constant 0 : index
      %13 = vector.load %arg5[%c0_12, %c0_13] : memref<1x128xf32, #tpu.memory_space<vmem>>, vector<1x128xf32>
      %14 = vector.broadcast %13 : vector<1x128xf32> to vector<16x128xf32>
      %15 = arith.addf %12, %14 : vector<16x128xf32>
      %cst_14 = arith.constant 0.000000e+00 : f32
      %16 = vector.broadcast %cst_14 : f32 to vector<16x128xf32>
      %17 = arith.maximumf %15, %16 : vector<16x128xf32>
      %c0_15 = arith.constant 0 : index
      %c0_16 = arith.constant 0 : index
      %18 = vector.load %arg6[%c0_15, %c0_16] : memref<16x128xf32, #tpu.memory_space<vmem>>, vector<16x128xf32>
      tpu.vector_store %arg6[%c0_15, %c0_16], %17 {strides = array<i32>} : memref<16x128xf32, #tpu.memory_space<vmem>>, vector<16x128xf32>,
    } else {
    }
    return
  }
  func.func @transform_0(%arg0: i32, %arg1: i32, %arg2: i32) -> (i32, i32) {
    %c0_i32 = arith.constant 0 : i32
    return %arg0, %arg2 : i32, i32
  }
  func.func @transform_1(%arg0: i32, %arg1: i32, %arg2: i32) -> (i32, i32) {
    %c0_i32 = arith.constant 0 : i32
    return %arg2, %arg1 : i32, i32
  }
  func.func @transform_2(%arg0: i32, %arg1: i32, %arg2: i32) -> (i32, i32) {
    %c0_i32 = arith.constant 0 : i32
    %c0_i32_0 = arith.constant 0 : i32
    return %c0_i32, %arg1 : i32, i32
  }
  func.func @transform_3(%arg0: i32, %arg1: i32, %arg2: i32) -> (i32, i32) {
    %c0_i32 = arith.constant 0 : i32
    return %arg0, %arg1 : i32, i32
  }
}

</mosaic_0001>

<bundles_post_ra>
// kernel: tpu_custom_call.1
= control target key start
LH: loop header
LB: loop body
LE: loop exit
PB: predicated region body
PF: predicated region fallthrough
CT: control target
= control target key end

     0   :  { %8 = vsyncpa [#allocation4], 0  ;;  %s369_s0 = inlined_call_operand.hbm [shape: bf16[16,128], index: 0, kind: input, shape index: {}]   ;;  %s370_s1 = inlined_call_operand.hbm [shape: bf16[128,128], index: 1, kind: input, shape index: {}]   ;;  %s371_s2 = inlined_call_operand.vmem [shape: f32[1,128], index: 2, kind: input, shape index: {}]   ;;  %s372_s3 = inlined_call_operand.hbm [shape: f32[16,128], index: 3, kind: output, shape index: {}]  }
   0x1   :  { %9 = vsyncpa [#allocation7], 0 }
   0x2   :  { %10 = vsyncpa [#allocation5], 0  ;;  %s328_s12 = smov [#allocation3]  }
   0x3   :  { %s16_s13 = sshll.u32 %s328_s12, 4  ;;  %s17_s13 = int_to_ptr.vmem [resolvable:$true] %s16_s13 }
   0x4   :  { %s270_s14 = scalar_lea.vmem %s17_s13, 128  ;;  %p275_p1 = scmp.lt.s32.totalorder %s17_s13, %s17_s13 }
   0x5   :  { %p271_p0 = scmp.ne.s32.totalorder %s17_s13, %s270_s14  ;;  %p276_p2 = scmp.lt.s32.totalorder %s270_s14, %s270_s14 }
   0x7   :  { %p277_p3 = por %p276_p2, %p275_p1 }
   0x9   :  { %p278_p4 = pnand %p277_p3, %p271_p0 }
   0xb   :  { %281 = shalt.err (!%p278_p4)
}
   0xc   :  { %s329_s15 = smov 64   ;;  %s330_s16 = smov 4  }
   0xd   :  { %22 = dma.hbm_to_vmem [thread:$0]  %s369_s0, 128, %s17_s13, [#allocation4], %s329_s15, %s329_s15, %s330_s16  }
   0xe   :  { %s331_s19 = smov [#allocation6]  }
   0xf   :  { %s28_s20 = sshll.u32 %s331_s19, 4  ;;  %s29_s20 = int_to_ptr.vmem [resolvable:$true] %s28_s20 }
  0x10   :  { %s290_s21 = scalar_lea.vmem %s29_s20, 1024  ;;  %p295_p6 = scmp.lt.s32.totalorder %s29_s20, %s29_s20 }
  0x11   :  { %p291_p5 = scmp.ne.s32.totalorder %s29_s20, %s290_s21  ;;  %p296_p7 = scmp.lt.s32.totalorder %s290_s21, %s290_s21 }
  0x13   :  { %p297_p8 = por %p296_p7, %p295_p6 }
  0x15   :  { %p298_p9 = pnand %p297_p8, %p291_p5 }
  0x17   :  { %301 = shalt.err (!%p298_p9)
}
  0x18   :  { %34 = dma.hbm_to_vmem [thread:$0]  %s370_s1, 1024, %s29_s20, [#allocation7], %s329_s15, %s329_s15, %s330_s16  }
  0x19   :  { %322 = dma.done.wait [#allocation4], 128  }
  0x1a   :  { %323 = vsyncadd [#allocation4], 4294967168 }
  0x1b   :  { %324 = dma.done.wait [#allocation7], 1024  }
  0x1c   :  { %325 = vsyncadd [#allocation7], 4294966272  ;;  %v332_v0 = vmov 0.0   ;;  %vm333_vm0 = vmmov 0   ;;  %v253_v1 = vld [vmem:[#allocation6 + $0x38] sm:$0xff]   ;;  %v254_v2 = vld [vmem:[#allocation6 + $0x30] sm:$0xff]  }
  0x1d   :  { %224 = vmatprep.subr.bf16.mxu0 %v332_v0  ;;  %240 = vmatprep.mubr.msk.bf16.mxu0 %vm333_vm0, %v332_v0  ;;  %v255_v3 = vld [vmem:[#allocation6 + $0x28] sm:$0xff]   ;;  %v256_v4 = vld [vmem:[#allocation6 + $0x20] sm:$0xff]   ;;  %v257_v5 = vld [vmem:[#allocation6 + $0x18] sm:$0xff]   ;;  %s334_s24 = smov [#allocation8]  }
  0x1e   :  { %225 = vmatpush3.bf16.msra.mxu0 %v253_v1  ;;  %v258_v6 = vld [vmem:[#allocation6 + $0x10] sm:$0xff]   ;;  %v259_v7 = vld [vmem:[#allocation6 + $0x8] sm:$0xff]   ;;  %v260_v8 = vld [vmem:[#allocation6] sm:$0xff]   ;;  %s192_s25 = sshll.u32 %s334_s24, 4  ;;  %s193_s25 = int_to_ptr.vmem [resolvable:$true] %s192_s25 }
  0x1f   :  { %226 = vmatprep.subr.bf16.mxu0 %v332_v0  ;;  %v261_v9 = vld [vmem:[#allocation3] sm:$0xff]   ;;  %s302_s26 = scalar_lea.vmem %s193_s25, 256  ;;  %p307_p11 = scmp.lt.s32.totalorder %s193_s25, %s193_s25 }
  0x20   :  { %v214_v10 = vld [vmem:[%s371_s2] ss:$0 sm:$0xff]  ;;  %p303_p10 = scmp.ne.s32.totalorder %s193_s25, %s302_s26  ;;  %p308_p12 = scmp.lt.s32.totalorder %s302_s26, %s302_s26 }
  0x22   :  { %227 = vmatpush3.bf16.msra.mxu0 %v254_v2  ;;  %p309_p13 = por %p308_p12, %p307_p11 }
  0x23   :  { %228 = vmatprep.subr.bf16.mxu0 %v332_v0 }
  0x24   :  { %p310_p0 = pnand %p309_p13, %p303_p10 }
  0x26   :  { %229 = vmatpush3.bf16.msra.mxu0 %v255_v3 }
  0x27   :  { %230 = vmatprep.subr.bf16.mxu0 %v332_v0 }
  0x2a   :  { %231 = vmatpush3.bf16.msra.mxu0 %v256_v4 }
  0x2b   :  { %232 = vmatprep.subr.bf16.mxu0 %v332_v0 }
  0x2e   :  { %233 = vmatpush3.bf16.msra.mxu0 %v257_v5 }
  0x2f   :  { %234 = vmatprep.subr.bf16.mxu0 %v332_v0 }
  0x32   :  { %235 = vmatpush3.bf16.msra.mxu0 %v258_v6 }
  0x33   :  { %236 = vmatprep.subr.bf16.mxu0 %v332_v0 }
  0x36   :  { %237 = vmatpush3.bf16.msra.mxu0 %v259_v7 }
  0x37   :  { %238 = vmatprep.subr.bf16.mxu0 %v332_v0 }
  0x3a   :  { %239 = vmatpush3.bf16.msra.mxu0 %v260_v8 }
  0x3d   :  { %241 = vmatmul.mubr.bf16.vlgmr.msra.gmra.mxu0 %v261_v9 }
  0xfd   :  { %v158_v11 = vpop.f32.mrf.mxu0 }
  0xfe   :  { %v181_v12 = vadd.f32 %v214_v10, %v158_v11 }
  0xff   :  { %v242_v13 = vpop.f32.mrf.mxu0 }
 0x100   :  { %v183_v14 = vmax.f32 %v181_v12, 0.0 }
 0x101   :  { %v161_v15 = vpop.f32.mrf.mxu0 }
 0x102   :  { %185 = vst [vmem:[#allocation8] sm:$0xff] %v183_v14  ;;  %v182_v16 = vadd.f32 %v214_v10, %v161_v15 }
 0x103   :  { %v243_v17 = vpop.f32.mrf.mxu0 }
 0x104   :  { %v184_v18 = vmax.f32 %v182_v16, 0.0 }
 0x106   :  { %186 = vst [vmem:[#allocation8 + $0x8] sm:$0xff] %v184_v18 }
 0x107   :  { %313 = shalt.err (!%p310_p0)
}
 0x108   :  { %s335_s2 = smov 128   ;;  %s336_s27 = smov 8  }
 0x109   :  { %198 = dma.vmem_to_hbm [thread:$0]  %s193_s25, 256, %s372_s3, [#allocation5], %s335_s2, %s335_s2, %s336_s27  }
 0x10a   :  { %326 = dma.done.wait [#allocation5], 256  }
 0x10b   :  { %327 = vsyncadd [#allocation5], 4294967040 }
 0x10c   :  { %202 = vsyncpa [#allocation4], 1 }
 0x10d   :  { %203 = vsyncpa [#allocation7], 1 }
 0x10e   :  { %204 = vsyncpa [#allocation5], 1 }

</bundles_post_ra>
